<compile_context>
chip_gen: v7x
topology: tpu7x:2x2x1
jax: 0.10.0
libtpu: 0.0.40
codegen_flags: <defaults>
</compile_context>

<pallas_src>
import functools

import jax
import jax.numpy as jnp
from jax.experimental import pallas as pl
from jax.experimental.pallas import tpu as pltpu


_LANE_WIDTH_CANDIDATES = (4096, 2048, 1024, 512, 256, 128)


def _scaled_tanh_kernel(x_ref, o_ref, *, scale, shift, compute_dtype):
    # scale/shift are Python floats (weak-typed), so the whole affine stays in
    # compute_dtype: bf16 on v6e/v7x for bf16 I/O (one EUP push per packed
    # vreg), f32 elsewhere.  Cast back to the I/O dtype on store.
    x = x_ref[...].astype(compute_dtype)
    o_ref[...] = (scale * jnp.tanh(x) + shift).astype(o_ref.dtype)


@functools.lru_cache(maxsize=1)
def _tpu_params():
    """Returns (vmem_capacity_bytes, native_bf16_compute)."""
    vmem_cap = 64 << 20          # conservative default (v7x-sized VMEM)
    native_bf16 = True           # v6e / v7x have bf16 VPU + EUP
    try:
        info = pltpu.get_tpu_info()
        vmem_cap = int(getattr(info, "vmem_capacity_bytes", vmem_cap))
    except Exception:
        pass
    try:
        kind = jax.devices()[0].device_kind.lower()
        # Pre-v6 chips (v5e/v5p/v4/...) have no bf16 VPU/EUP -> compute in f32.
        if any(v in kind for v in ("v2", "v3", "v4", "v5")):
            native_bf16 = False
    except Exception:
        pass
    return vmem_cap, native_bf16


def _pallas_scaled_tanh_2d(x2d, *, scale, shift, compute_dtype,
                           target_block_bytes, vmem_cap):
    """Run the kernel on a lane-dense (rows, width) slab; width % 128 == 0."""
    rows, width = x2d.shape
    itemsize = jnp.dtype(x2d.dtype).itemsize
    sublane_min = max(8, 32 // itemsize)          # 8 f32 / 16 bf16 / 32 int8

    # Never let a single block exceed ~1/8 of physical VMEM (double-buffered
    # in+out must fit with headroom).
    target_block_bytes = min(target_block_bytes, vmem_cap // 8)

    max_tile_rows = (target_block_bytes // (width * itemsize)) // sublane_min * sublane_min
    max_tile_rows = max(sublane_min, max_tile_rows)

    if rows <= sublane_min:
        tile_rows = rows          # single full-extent block (always a legal tiling)
    else:
        # Guarantee >= 2 grid steps so the "parallel" axis feeds both v7x
        # TensorCores (and overlaps DMA with compute on 1-TC chips).
        half_rows = pl.cdiv(pl.cdiv(rows, 2), sublane_min) * sublane_min
        tile_rows = min(max_tile_rows, half_rows)

    grid = (pl.cdiv(rows, tile_rows),)            # partial last block is masked by Pallas
    block_bytes = tile_rows * width * itemsize

    # Double-buffered in + out = 4 blocks resident; budget 6 with headroom,
    # capped at ~75% of physical VMEM (~48 MiB on v7x, ~96 MiB on v5e/v6e).
    vmem_limit = int(min(int(vmem_cap * 0.75), max(16 << 20, 6 * block_bytes)))

    total = rows * width
    cost = pl.CostEstimate(
        flops=2 * total,
        transcendentals=total,
        bytes_accessed=2 * total * itemsize,
    )

    kernel = functools.partial(_scaled_tanh_kernel, scale=scale, shift=shift,
                               compute_dtype=compute_dtype)

    return pl.pallas_call(
        kernel,
        out_shape=jax.ShapeDtypeStruct((rows, width), x2d.dtype),
        grid_spec=pltpu.PrefetchScalarGridSpec(
            num_scalar_prefetch=0,
            grid=grid,
            in_specs=[pl.BlockSpec((tile_rows, width), lambda i: (i, 0))],
            out_specs=pl.BlockSpec((tile_rows, width), lambda i: (i, 0)),
        ),
        compiler_params=pltpu.CompilerParams(
            # NOTE: switch to pltpu.CORE_PARALLEL only if an xprof trace shows a
            # single v7x TC active; "parallel" is the safe default everywhere.
            dimension_semantics=("parallel",),
            vmem_limit_bytes=vmem_limit,
        ),
        cost_estimate=cost,
    )(x2d)


def scaled_tanh(x, min_val, max_val, *, target_block_bytes=None):
    """Elementwise scale*tanh(x)+shift with scale=(max-min)/2, shift=scale+min.

    min_val/max_val mirror the nn.Module __init__ constants (static Python
    numbers) and are baked into the kernel as compile-time constants.
    """
    scale = (float(max_val) - float(min_val)) / 2.0
    shift = scale + float(min_val)

    orig_shape = x.shape
    orig_dtype = x.dtype
    total = x.size
    if total == 0:
        return x

    vmem_cap, native_bf16 = _tpu_params()
    if target_block_bytes is None:
        # ~8 MiB blocks on 128-MiB-VMEM chips (v5e/v6e), ~6 MiB on 64-MiB v7x.
        target_block_bytes = (8 << 20) if vmem_cap >= (96 << 20) else (6 << 20)

    if orig_dtype == jnp.bfloat16 and native_bf16:
        compute_dtype = jnp.bfloat16   # native bf16 VPU/EUP on v6e/v7x
    else:
        compute_dtype = jnp.float32    # v5e (no bf16 VPU/EUP) and all f32 inputs

    x_flat = x.reshape(-1)

    def run_bulk(flat_bulk):
        n = flat_bulk.size
        # Widest lane dimension that divides the element count -> free reshape,
        # lane-dense stores, exactly 1 HBM read + 1 HBM write in the kernel.
        width = next(c for c in _LANE_WIDTH_CANDIDATES if n % c == 0)
        rows = n // width
        out2d = _pallas_scaled_tanh_2d(
            flat_bulk.reshape(rows, width),
            scale=scale, shift=shift, compute_dtype=compute_dtype,
            target_block_bytes=target_block_bytes, vmem_cap=vmem_cap)
        return out2d.reshape(-1)

    bulk_total = (total // 128) * 128

    if bulk_total == total:
        # Hot path: size is a multiple of 128 -> no padding, no extra copies.
        return run_bulk(x_flat).reshape(orig_shape)

    if bulk_total == 0:
        # Fewer than 128 elements: not worth a kernel launch.
        y = (scale * jnp.tanh(x_flat.astype(compute_dtype)) + shift).astype(orig_dtype)
        return y.reshape(orig_shape)

    # Ragged fallback: Pallas kernel on the multiple-of-128 prefix, plain jnp on
    # the tiny tail (replaces the old whole-array pad+slice ~3x-traffic path).
    bulk_out = run_bulk(x_flat[:bulk_total])
    tail = x_flat[bulk_total:]
    tail_out = (scale * jnp.tanh(tail.astype(compute_dtype)) + shift).astype(orig_dtype)
    return jnp.concatenate([bulk_out, tail_out]).reshape(orig_shape)


def _ref(x, min_val, max_val):
    scale = (max_val - min_val) / 2.0
    shift = scale + min_val
    return scale * jnp.tanh(x.astype(jnp.float32)) + shift


if __name__ == "__main__":
    # ScaledTanh(min=-1.0, max=3.0)  =>  scale=2.0, shift=1.0
    min_val, max_val = -1.0, 3.0
    key = jax.random.PRNGKey(0)
    k1, k2, k3, k4, k5 = jax.random.split(key, 5)

    # 1) Module-shaped input (2, 4, 16, 16), f32 — single full-array block.
    x = jax.random.normal(k1, (2, 4, 16, 16), dtype=jnp.float32)
    y = jax.block_until_ready(scaled_tanh(x, min_val, max_val))
    assert y.shape == x.shape and y.dtype == x.dtype
    assert jnp.allclose(y, _ref(x, min_val, max_val), atol=1e-6)

    # 2) Multi-block path (small target block to exercise the grid).
    x2 = jax.random.normal(k2, (4, 8, 32, 128), dtype=jnp.float32)
    y2 = jax.block_until_ready(
        scaled_tanh(x2, min_val, max_val, target_block_bytes=64 << 10))
    assert jnp.allclose(y2, _ref(x2, min_val, max_val), atol=1e-6)

    # 3) Partial-last-block + >=2-block split path.
    x3 = jax.random.normal(k3, (2, 3, 24, 32), dtype=jnp.float32)
    y3 = jax.block_until_ready(
        scaled_tanh(x3, min_val, max_val, target_block_bytes=16 << 10))
    assert jnp.allclose(y3, _ref(x3, min_val, max_val), atol=1e-6)

    # 4) bf16 I/O (bf16-native compute on v6e/v7x, f32 compute on v5e-).
    x4 = jax.random.normal(k4, (2, 4, 16, 16), dtype=jnp.bfloat16)
    y4 = jax.block_until_ready(scaled_tanh(x4, min_val, max_val))
    assert y4.dtype == jnp.bfloat16
    assert jnp.allclose(y4.astype(jnp.float32), _ref(x4, min_val, max_val),
                        atol=5e-2)

    # 5) Ragged size (not a multiple of 128): bulk kernel + tiny jnp tail.
    x5 = jax.random.normal(k5, (2, 3, 5, 7), dtype=jnp.float32)   # 210 elems
    y5 = jax.block_until_ready(scaled_tanh(x5, min_val, max_val))
    assert y5.shape == x5.shape
    assert jnp.allclose(y5, _ref(x5, min_val, max_val), atol=1e-6)

    print("KERNEL_OK")
</pallas_src>

<mosaic_0001>
module attributes {stable_mosaic.version = 11 : i64} {
  func.func @_scaled_tanh_kernel(%arg0: i32, %arg1: memref<1x2048xf32, #tpu.memory_space<vmem>>, %arg2: memref<1x2048xf32, #tpu.memory_space<vmem>>) attributes {dimension_semantics = [#tpu.dimension_semantics<parallel>], iteration_bounds = array<i64: 1>, scalar_prefetch = 0 : i64, scratch_operands = 0 : i64, tpu.core_type = #tpu.core_type<tc>, window_params = [{transform_indices = @transform_0, window_bounds = array<i64: 1, 2048>}, {transform_indices = @transform_1, window_bounds = array<i64: 1, 2048>}]} {
    %c0 = arith.constant 0 : index
    %c0_0 = arith.constant 0 : index
    %0 = vector.load %arg1[%c0, %c0_0] : memref<1x2048xf32, #tpu.memory_space<vmem>>, vector<1x2048xf32>
    %1 = math.tanh %0 : vector<1x2048xf32>
    %cst = arith.constant 2.000000e+00 : f32
    %2 = vector.broadcast %cst : f32 to vector<1x2048xf32>
    %3 = arith.mulf %2, %1 : vector<1x2048xf32>
    %cst_1 = arith.constant 1.000000e+00 : f32
    %4 = vector.broadcast %cst_1 : f32 to vector<1x2048xf32>
    %5 = arith.addf %3, %4 : vector<1x2048xf32>
    %c0_2 = arith.constant 0 : index
    %c0_3 = arith.constant 0 : index
    %6 = vector.load %arg2[%c0_2, %c0_3] : memref<1x2048xf32, #tpu.memory_space<vmem>>, vector<1x2048xf32>
    tpu.vector_store %arg2[%c0_2, %c0_3], %5 {strides = array<i32>} : memref<1x2048xf32, #tpu.memory_space<vmem>>, vector<1x2048xf32>,
    return
  }
  func.func @transform_0(%arg0: i32) -> (i32, i32) {
    %c0_i32 = arith.constant 0 : i32
    %c0_i32_0 = arith.constant 0 : i32
    return %arg0, %c0_i32 : i32, i32
  }
  func.func @transform_1(%arg0: i32) -> (i32, i32) {
    %c0_i32 = arith.constant 0 : i32
    %c0_i32_0 = arith.constant 0 : i32
    return %arg0, %c0_i32 : i32, i32
  }
}

</mosaic_0001>

<bundles_post_ra>
// kernel: tpu_custom_call.1
= control target key start
LH: loop header
LB: loop body
LE: loop exit
PB: predicated region body
PF: predicated region fallthrough
CT: control target
= control target key end

     0   :  { %6 = vsyncpa [#allocation3], 0  ;;  %s136_s0 = inlined_call_operand.hbm [shape: f32[1,2048], index: 0, kind: input, shape index: {}]   ;;  %s137_s1 = inlined_call_operand.hbm [shape: f32[1,2048], index: 1, kind: output, shape index: {}]  }
   0x1   :  { %7 = vsyncpa [#allocation4], 0  ;;  %s100_s6 = smov [#allocation2]   ;;  %s52_s10 = scalar_lea.hbm %s136_s0, 256 }
   0x2   :  { %s14_s7 = sshll.u32 %s100_s6, 4  ;;  %p53_p0 = scmp.ne.s32.totalorder %s136_s0, %s52_s10  ;;  %s15_s7 = int_to_ptr.vmem [resolvable:$true] %s14_s7 }
   0x3   :  { %p56_p1 = scmp.lt.u32.totalorder %s52_s10, %s136_s0 }
   0x5   :  { %p58_p2 = pnand %p56_p1, %p53_p0 }
   0x7   :  { %61 = shalt.err (!%p58_p2)
}
   0x8   :  { %s62_s15 = scalar_lea.vmem %s15_s7, 256  ;;  %p67_p4 = scmp.lt.s32.totalorder %s15_s7, %s15_s7 }
   0x9   :  { %p63_p3 = scmp.ne.s32.totalorder %s15_s7, %s62_s15  ;;  %p68_p5 = scmp.lt.s32.totalorder %s62_s15, %s62_s15 }
   0xb   :  { %p69_p6 = por %p68_p5, %p67_p4 }
   0xd   :  { %p70_p7 = pnand %p69_p6, %p63_p3 }
   0xf   :  { %73 = shalt.err (!%p70_p7)
}
  0x10   :  { %17 = dma.hbm_to_vmem [thread:$0]  %s136_s0, 256, %s15_s7, [#allocation3]  }
  0x11   :  { %96 = dma.done.wait [#allocation3], 256  }
  0x12   :  { %97 = vsyncadd [#allocation3], 4294967040  ;;  %v21_v0 = vld [vmem:[#allocation2] sm:$0xff]  ;;  %v22_v1 = vld [vmem:[#allocation2 + $0x8] sm:$0xff]  ;;  %s101_s18 = smov [#allocation5]  }
  0x13   :  { %48 = vtanh.f32 %v21_v0  ;;  %s37_s19 = sshll.u32 %s101_s18, 4  ;;  %s38_s19 = int_to_ptr.vmem [resolvable:$true] %s37_s19 }
  0x14   :  { %50 = vtanh.f32 %v22_v1  ;;  %s74_s20 = scalar_lea.vmem %s38_s19, 256  ;;  %p79_p9 = scmp.lt.s32.totalorder %s38_s19, %s38_s19 }
  0x15   :  { %p75_p8 = scmp.ne.s32.totalorder %s38_s19, %s74_s20  ;;  %p80_p10 = scmp.lt.s32.totalorder %s74_s20, %s74_s20 }
  0x17   :  { %p81_p11 = por %p80_p10, %p79_p9 }
  0x19   :  { %p82_p12 = pnand %p81_p11, %p75_p8 }
  0x1d   :  { %v49_v2 = vpop.eup %48 }
  0x1e   :  { %v51_v3 = vpop.eup %50  ;;  %v25_v4 = vmul.f32 2.0, %v49_v2 }
  0x1f   :  { %v26_v5 = vmul.f32 2.0, %v51_v3 }
  0x20   :  { %v27_v6 = vadd.f32 1.0, %v25_v4 }
  0x21   :  { %v28_v7 = vadd.f32 1.0, %v26_v5 }
  0x22   :  { %29 = vst [vmem:[#allocation5] sm:$0xff] %v27_v6 }
  0x23   :  { %30 = vst [vmem:[#allocation5 + $0x8] sm:$0xff] %v28_v7 }
  0x24   :  { %85 = shalt.err (!%p82_p12)
}
  0x25   :  { %s86_s22 = scalar_lea.hbm %s137_s1, 256 }
  0x26   :  { %p87_p13 = scmp.ne.s32.totalorder %s137_s1, %s86_s22  ;;  %p90_p0 = scmp.lt.u32.totalorder %s86_s22, %s137_s1 }
  0x28   :  { %p92_p1 = pnand %p90_p0, %p87_p13 }
  0x2a   :  { %95 = shalt.err (!%p92_p1)
}
  0x2b   :  { %40 = dma.vmem_to_hbm [thread:$0]  %s38_s19, 256, %s137_s1, [#allocation4]  }
  0x2c   :  { %98 = dma.done.wait [#allocation4], 256  }
  0x2d   :  { %99 = vsyncadd [#allocation4], 4294967040 }
  0x2e   :  { %44 = vsyncpa [#allocation3], 1 }
  0x2f   :  { %45 = vsyncpa [#allocation4], 1 }

</bundles_post_ra>
